<compile_context>
chip_gen: v7x
topology: tpu7x:2x2x1
jax: 0.10.0
libtpu: 0.0.40
codegen_flags: <defaults>
</compile_context>

<pallas_src>
import functools

import jax
import jax.numpy as jnp
from jax.experimental import pallas as pl
from jax.experimental.pallas import tpu as pltpu


def _round_up(x: int, m: int) -> int:
    return (x + m - 1) // m * m


def _round_down(x: int, m: int) -> int:
    return max(m, (x // m) * m)


def _contrast_loss_kernel(pred_ref, true_ref, out_ref, acc_ref, *,
                          epsilon: float, tb: int, b_real: int, b_padded: bool):
    i = pl.program_id(0)
    j = pl.program_id(1)
    nj = pl.num_programs(1)

    # Reset the per-i-tile accumulators at the start of the j reduction loop.
    @pl.when(j == 0)
    def _():
        acc_ref[0] = jnp.float32(0.0)   # pos partial sum
        acc_ref[1] = jnp.float32(0.0)   # neg partial sum

    p = pred_ref[...]                   # (TB, Dp) native dtype -> straight to MXU
    t = true_ref[...]                   # (TB, Dp)
    pf = p.astype(jnp.float32)
    tf = t.astype(jnp.float32)

    # Pairwise squared distances: native-dtype MXU dot with f32 accumulation,
    # row norms on the VPU in f32.  d2[a, b] = ||p_a - t_b||^2.
    dots = jax.lax.dot_general(
        p, t, (((1,), (1,)), ((), ())), preferred_element_type=jnp.float32
    )                                                        # (TB, TB) = p @ t.T
    p_sq = jnp.sum(pf * pf, axis=-1, keepdims=True)          # (TB, 1)
    t_sq = jnp.sum(tf * tf, axis=-1, keepdims=True)          # (TB, 1)
    d2 = jnp.maximum(p_sq + t_sq.T - 2.0 * dots, 0.0)        # (TB, TB)

    # Negative (push-apart) term, fused: sqrt (EUP slot) -> hinge -> square.
    d = jnp.sqrt(d2)
    hinge = jnp.maximum(jnp.float32(epsilon) - d, 0.0)
    neg_sq = hinge * hinge

    if b_padded:
        # Only emitted when B was padded up to a tile multiple.
        row_ids = i * tb + jax.lax.broadcasted_iota(jnp.int32, (tb, 1), 0)
        col_ids = j * tb + jax.lax.broadcasted_iota(jnp.int32, (1, tb), 1)
        neg_sq = jnp.where((row_ids < b_real) & (col_ids < b_real), neg_sq, 0.0)

    # Off-diagonal tiles: no masks at all, just reduce.
    @pl.when(i != j)
    def _():
        acc_ref[1] = acc_ref[1] + jnp.sum(neg_sq)

    # Diagonal tiles: positives computed directly from the (TB, D) blocks on the
    # VPU (padded rows are all-zero so they contribute nothing); matched pairs
    # are excluded from the negative sum with a single diagonal select.
    @pl.when(i == j)
    def _():
        diff = pf - tf
        acc_ref[0] = acc_ref[0] + jnp.sum(diff * diff)
        row = jax.lax.broadcasted_iota(jnp.int32, (tb, tb), 0)
        col = jax.lax.broadcasted_iota(jnp.int32, (tb, tb), 1)
        acc_ref[1] = acc_ref[1] + jnp.sum(jnp.where(row == col, 0.0, neg_sq))

    # Finalize: lane-dense (1, 128) row of partial sums for this i-tile.
    @pl.when(j == nj - 1)
    def _():
        lane = jax.lax.broadcasted_iota(jnp.int32, (1, 128), 1)
        out_ref[...] = jnp.where(
            lane == 0, acc_ref[0], jnp.where(lane == 1, acc_ref[1], 0.0)
        )


def contrast_loss(pred_emb: jax.Array, true_emb: jax.Array, epsilon: float,
                  *, tile_b: int = 512) -> jax.Array:
    """Scalar contrastive loss between pred_emb and true_emb, both (B, D)."""
    assert pred_emb.shape == true_emb.shape and pred_emb.ndim == 2
    b, d = pred_emb.shape

    d_pad = max(128, _round_up(d, 128))     # lane axis / MXU contraction dim
    itemsize = jnp.dtype(pred_emb.dtype).itemsize

    # Row-tile size: multiple of 8 (sublanes).  Cap it so the pipelined input
    # blocks (2 inputs x 2 buffers x TB x Dp) stay within a conservative input
    # budget and the (TB, TB) f32 temporaries stay small, leaving headroom
    # inside the 32 MiB scoped-VMEM limit on v5e/v6e/v7x.
    input_budget = 16 * 1024 * 1024
    tb_from_inputs = _round_down(input_budget // (4 * d_pad * itemsize), 8)
    tb_cap = min(tile_b, tb_from_inputs)
    if b <= tb_cap:
        tb = max(8, _round_up(b, 8))
    else:
        tb = tb_cap
    b_pad = _round_up(b, tb)

    pred = pred_emb
    true = true_emb
    if (b_pad, d_pad) != (b, d):
        pred = jnp.pad(pred, ((0, b_pad - b), (0, d_pad - d)))
        true = jnp.pad(true, ((0, b_pad - b), (0, d_pad - d)))

    num_i = b_pad // tb
    num_j = b_pad // tb

    kernel = functools.partial(
        _contrast_loss_kernel,
        epsilon=float(epsilon),
        tb=tb,
        b_real=b,
        b_padded=(b_pad != b),
    )

    cost = pl.CostEstimate(
        flops=2 * b_pad * b_pad * d_pad + 8 * b_pad * b_pad,
        transcendentals=b_pad * b_pad,
        bytes_accessed=(num_i + num_j) * b_pad * d_pad * itemsize
        + num_i * 128 * 4,
    )

    parts = pl.pallas_call(
        kernel,
        out_shape=jax.ShapeDtypeStruct((num_i, 128), jnp.float32),
        grid_spec=pltpu.PrefetchScalarGridSpec(
            num_scalar_prefetch=0,
            grid=(num_i, num_j),
            in_specs=[
                pl.BlockSpec((tb, d_pad), lambda i, j: (i, 0)),   # pred rows (i)
                pl.BlockSpec((tb, d_pad), lambda i, j: (j, 0)),   # true rows (j)
            ],
            out_specs=pl.BlockSpec((1, 128), lambda i, j: (i, 0)),
            scratch_shapes=[pltpu.SMEM((2,), jnp.float32)],
        ),
        compiler_params=pltpu.CompilerParams(
            dimension_semantics=("parallel", "arbitrary"),
            vmem_limit_bytes=32 * 1024 * 1024,
        ),
        cost_estimate=cost,
    )(pred, true)

    pos_loss = jnp.sum(parts[:, 0]) / jnp.float32(b)
    if b > 1:
        neg_loss = jnp.sum(parts[:, 1]) / jnp.float32(b * (b - 1))
    else:
        # Guard the b*(b-1) division: no negative pairs exist when B == 1.
        neg_loss = jnp.float32(0.0)
    return pos_loss + neg_loss


def _contrast_loss_ref(pred_emb, true_emb, epsilon):
    p = pred_emb.astype(jnp.float32)
    t = true_emb.astype(jnp.float32)
    b = p.shape[0]
    d2 = (
        jnp.sum(p * p, -1, keepdims=True)
        + jnp.sum(t * t, -1, keepdims=True).T
        - 2.0 * (p @ t.T)
    )
    d2 = jnp.maximum(d2, 0.0)
    d = jnp.sqrt(d2)
    eye = jnp.eye(b, dtype=jnp.float32)
    pos = jnp.sum((p - t) ** 2) / b
    if b > 1:
        neg = jnp.sum((1.0 - eye) * jnp.maximum(epsilon - d, 0.0) ** 2) / (b * (b - 1))
    else:
        neg = jnp.float32(0.0)
    return pos + neg


if __name__ == "__main__":
    B, D = 8, 32
    EPSILON = 1.0

    key = jax.random.PRNGKey(0)
    k1, k2 = jax.random.split(key)
    pred_emb = jax.random.normal(k1, (B, D), dtype=jnp.float32)
    true_emb = jax.random.normal(k2, (B, D), dtype=jnp.float32)

    loss = contrast_loss(pred_emb, true_emb, EPSILON)
    loss = jax.block_until_ready(loss)

    ref = _contrast_loss_ref(pred_emb, true_emb, EPSILON)
    assert jnp.isfinite(loss), "loss is not finite"
    assert jnp.allclose(loss, ref, rtol=1e-5, atol=1e-5), (loss, ref)

    print("KERNEL_OK")
</pallas_src>

<mosaic_0001>
module attributes {stable_mosaic.version = 11 : i64} {
  func.func @_contrast_loss_kernel(%arg0: i32, %arg1: i32, %arg2: memref<8x128xf32, #tpu.memory_space<vmem>>, %arg3: memref<8x128xf32, #tpu.memory_space<vmem>>, %arg4: memref<1x128xf32, #tpu.memory_space<vmem>>, %arg5: memref<2xf32, #tpu.memory_space<smem>>) attributes {dimension_semantics = [#tpu.dimension_semantics<parallel>, #tpu.dimension_semantics<arbitrary>], iteration_bounds = array<i64: 1, 1>, scalar_prefetch = 0 : i64, scratch_operands = 1 : i64, tpu.core_type = #tpu.core_type<tc>, window_params = [{transform_indices = @transform_0, window_bounds = array<i64: 8, 128>}, {transform_indices = @transform_1, window_bounds = array<i64: 8, 128>}, {transform_indices = @transform_2, window_bounds = array<i64: 1, 128>}]} {
    %c0_i32 = arith.constant 0 : i32
    %0 = arith.cmpi eq, %arg1, %c0_i32 : i32
    %1 = arith.extui %0 : i1 to i32
    %c0_i32_0 = arith.constant 0 : i32
    %2 = arith.cmpi ne, %1, %c0_i32_0 : i32
    scf.if %2 {
      %cst_14 = arith.constant 0.000000e+00 : f32
      %c0_15 = arith.constant 0 : index
      %36 = memref.load %arg5[%c0_15] : memref<2xf32, #tpu.memory_space<smem>>
      memref.store %cst_14, %arg5[%c0_15] : memref<2xf32, #tpu.memory_space<smem>>
      %cst_16 = arith.constant 0.000000e+00 : f32
      %c1 = arith.constant 1 : index
      %37 = memref.load %arg5[%c1] : memref<2xf32, #tpu.memory_space<smem>>
      memref.store %cst_16, %arg5[%c1] : memref<2xf32, #tpu.memory_space<smem>>
    } else {
    }
    %c0 = arith.constant 0 : index
    %c0_1 = arith.constant 0 : index
    %3 = vector.load %arg2[%c0, %c0_1] : memref<8x128xf32, #tpu.memory_space<vmem>>, vector<8x128xf32>
    %c0_2 = arith.constant 0 : index
    %c0_3 = arith.constant 0 : index
    %4 = vector.load %arg3[%c0_2, %c0_3] : memref<8x128xf32, #tpu.memory_space<vmem>>, vector<8x128xf32>
    %cst = arith.constant dense<0.000000e+00> : vector<8x8xf32>
    %5 = tpu.matmul %3, %4, %cst {dimension_numbers = #tpu.dot_dimension_numbers<[1], [1], [0], [0], [0, 0, 1, 0], [], []>} : vector<8x128xf32>, vector<8x128xf32>, vector<8x8xf32> -> vector<8x8xf32>
    %6 = arith.mulf %3, %3 : vector<8x128xf32>
    %cst_4 = arith.constant dense<0.000000e+00> : vector<8xf32>
    %7 = vector.multi_reduction <add>, %6, %cst_4 [1] : vector<8x128xf32> to vector<8xf32>
    %8 = vector.shape_cast %7 : vector<8xf32> to vector<8x1xf32>
    %9 = arith.mulf %4, %4 : vector<8x128xf32>
    %cst_5 = arith.constant dense<0.000000e+00> : vector<8xf32>
    %10 = vector.multi_reduction <add>, %9, %cst_5 [1] : vector<8x128xf32> to vector<8xf32>
    %11 = vector.shape_cast %10 : vector<8xf32> to vector<8x1xf32>
    %12 = tpu.transpose %11, [1, 0] : vector<8x1xf32> -> vector<1x8xf32>
    %13 = vector.broadcast %8 : vector<8x1xf32> to vector<8x8xf32>
    %14 = vector.broadcast %12 : vector<1x8xf32> to vector<8x8xf32>
    %15 = arith.addf %13, %14 : vector<8x8xf32>
    %cst_6 = arith.constant 2.000000e+00 : f32
    %16 = vector.broadcast %cst_6 : f32 to vector<8x8xf32>
    %17 = arith.mulf %16, %5 : vector<8x8xf32>
    %18 = arith.subf %15, %17 : vector<8x8xf32>
    %cst_7 = arith.constant 0.000000e+00 : f32
    %19 = vector.broadcast %cst_7 : f32 to vector<8x8xf32>
    %20 = arith.maximumf %18, %19 : vector<8x8xf32>
    %21 = math.sqrt %20 : vector<8x8xf32>
    %cst_8 = arith.constant 1.000000e+00 : f32
    %22 = vector.broadcast %cst_8 : f32 to vector<8x8xf32>
    %23 = arith.subf %22, %21 : vector<8x8xf32>
    %cst_9 = arith.constant 0.000000e+00 : f32
    %24 = vector.broadcast %cst_9 : f32 to vector<8x8xf32>
    %25 = arith.maximumf %23, %24 : vector<8x8xf32>
    %26 = arith.mulf %25, %25 : vector<8x8xf32>
    %27 = arith.cmpi ne, %arg0, %arg1 : i32
    %28 = arith.extui %27 : i1 to i32
    %c0_i32_10 = arith.constant 0 : i32
    %29 = arith.cmpi ne, %28, %c0_i32_10 : i32
    scf.if %29 {
      %c1 = arith.constant 1 : index
      %36 = memref.load %arg5[%c1] : memref<2xf32, #tpu.memory_space<smem>>
      %37 = vector.shape_cast %26 : vector<8x8xf32> to vector<1x8x8xf32>
      %cst_14 = arith.constant dense<0.000000e+00> : vector<1xf32>
      %38 = vector.multi_reduction <add>, %37, %cst_14 [1, 2] : vector<1x8x8xf32> to vector<1xf32>
      %39 = vector.shape_cast %38 : vector<1xf32> to vector<1x1x1xf32>
      %40 = vector.extract %39[0, 0, 0] : f32 from vector<1x1x1xf32>
      %41 = arith.addf %36, %40 : f32
      %c1_15 = arith.constant 1 : index
      %42 = memref.load %arg5[%c1_15] : memref<2xf32, #tpu.memory_space<smem>>
      memref.store %41, %arg5[%c1_15] : memref<2xf32, #tpu.memory_space<smem>>
    } else {
    }
    %30 = arith.cmpi eq, %arg0, %arg1 : i32
    %31 = arith.extui %30 : i1 to i32
    %c0_i32_11 = arith.constant 0 : i32
    %32 = arith.cmpi ne, %31, %c0_i32_11 : i32
    scf.if %32 {
      %36 = arith.subf %3, %4 : vector<8x128xf32>
      %c0_14 = arith.constant 0 : index
      %37 = memref.load %arg5[%c0_14] : memref<2xf32, #tpu.memory_space<smem>>
      %38 = arith.mulf %36, %36 : vector<8x128xf32>
      %39 = vector.shape_cast %38 : vector<8x128xf32> to vector<1x8x128xf32>
      %cst_15 = arith.constant dense<0.000000e+00> : vector<1xf32>
      %40 = vector.multi_reduction <add>, %39, %cst_15 [1, 2] : vector<1x8x128xf32> to vector<1xf32>
      %41 = vector.shape_cast %40 : vector<1xf32> to vector<1x1x1xf32>
      %42 = vector.extract %41[0, 0, 0] : f32 from vector<1x1x1xf32>
      %43 = arith.addf %37, %42 : f32
      %c0_16 = arith.constant 0 : index
      %44 = memref.load %arg5[%c0_16] : memref<2xf32, #tpu.memory_space<smem>>
      memref.store %43, %arg5[%c0_16] : memref<2xf32, #tpu.memory_space<smem>>
      %45 = tpu.iota {dimensions = array<i32: 0>} : vector<8x8xi32>
      %46 = tpu.iota {dimensions = array<i32: 1>} : vector<8x8xi32>
      %c1 = arith.constant 1 : index
      %47 = memref.load %arg5[%c1] : memref<2xf32, #tpu.memory_space<smem>>
      %48 = arith.cmpi eq, %45, %46 : vector<8x8xi32>
      %cst_17 = arith.constant 0.000000e+00 : f32
      %49 = vector.broadcast %cst_17 : f32 to vector<8x8xf32>
      %50 = arith.select %48, %49, %26 : vector<8x8xi1>, vector<8x8xf32>
      %51 = vector.shape_cast %50 : vector<8x8xf32> to vector<1x8x8xf32>
      %cst_18 = arith.constant dense<0.000000e+00> : vector<1xf32>
      %52 = vector.multi_reduction <add>, %51, %cst_18 [1, 2] : vector<1x8x8xf32> to vector<1xf32>
      %53 = vector.shape_cast %52 : vector<1xf32> to vector<1x1x1xf32>
      %54 = vector.extract %53[0, 0, 0] : f32 from vector<1x1x1xf32>
      %55 = arith.addf %47, %54 : f32
      %c1_19 = arith.constant 1 : index
      %56 = memref.load %arg5[%c1_19] : memref<2xf32, #tpu.memory_space<smem>>
      memref.store %55, %arg5[%c1_19] : memref<2xf32, #tpu.memory_space<smem>>
    } else {
    }
    %c0_i32_12 = arith.constant 0 : i32
    %33 = arith.cmpi eq, %arg1, %c0_i32_12 : i32
    %34 = arith.extui %33 : i1 to i32
    %c0_i32_13 = arith.constant 0 : i32
    %35 = arith.cmpi ne, %34, %c0_i32_13 : i32
    scf.if %35 {
      %36 = tpu.iota {dimensions = array<i32: 1>} : vector<1x128xi32>
      %c0_i32_14 = arith.constant 0 : i32
      %37 = vector.broadcast %c0_i32_14 : i32 to vector<1x128xi32>
      %38 = arith.cmpi eq, %36, %37 : vector<1x128xi32>
      %c0_15 = arith.constant 0 : index
      %39 = memref.load %arg5[%c0_15] : memref<2xf32, #tpu.memory_space<smem>>
      %c1_i32 = arith.constant 1 : i32
      %40 = vector.broadcast %c1_i32 : i32 to vector<1x128xi32>
      %41 = arith.cmpi eq, %36, %40 : vector<1x128xi32>
      %c1 = arith.constant 1 : index
      %42 = memref.load %arg5[%c1] : memref<2xf32, #tpu.memory_space<smem>>
      %cst_16 = arith.constant 0.000000e+00 : f32
      %43 = vector.broadcast %42 : f32 to vector<1x128xf32>
      %44 = vector.broadcast %cst_16 : f32 to vector<1x128xf32>
      %45 = arith.select %41, %43, %44 : vector<1x128xi1>, vector<1x128xf32>
      %46 = vector.broadcast %39 : f32 to vector<1x128xf32>
      %47 = arith.select %38, %46, %45 : vector<1x128xi1>, vector<1x128xf32>
      %c0_17 = arith.constant 0 : index
      %c0_18 = arith.constant 0 : index
      %48 = vector.load %arg4[%c0_17, %c0_18] : memref<1x128xf32, #tpu.memory_space<vmem>>, vector<1x128xf32>
      tpu.vector_store %arg4[%c0_17, %c0_18], %47 {strides = array<i32>} : memref<1x128xf32, #tpu.memory_space<vmem>>, vector<1x128xf32>,
    } else {
    }
    return
  }
  func.func @transform_0(%arg0: i32, %arg1: i32) -> (i32, i32) {
    %c0_i32 = arith.constant 0 : i32
    %c0_i32_0 = arith.constant 0 : i32
    return %arg0, %c0_i32 : i32, i32
  }
  func.func @transform_1(%arg0: i32, %arg1: i32) -> (i32, i32) {
    %c0_i32 = arith.constant 0 : i32
    %c0_i32_0 = arith.constant 0 : i32
    return %arg1, %c0_i32 : i32, i32
  }
  func.func @transform_2(%arg0: i32, %arg1: i32) -> (i32, i32) {
    %c0_i32 = arith.constant 0 : i32
    %c0_i32_0 = arith.constant 0 : i32
    return %arg0, %c0_i32 : i32, i32
  }
}

</mosaic_0001>

<bundles_post_ra>
// kernel: tpu_custom_call.1
= control target key start
LH: loop header
LB: loop body
LE: loop exit
PB: predicated region body
PF: predicated region fallthrough
CT: control target
= control target key end

     0   :  { %7 = vsyncpa [#allocation4], 0  ;;  %s410_s0 = inlined_call_operand.hbm [shape: f32[8,128], index: 0, kind: input, shape index: {}]   ;;  %s411_s1 = inlined_call_operand.hbm [shape: f32[8,128], index: 1, kind: input, shape index: {}]   ;;  %s412_s2 = inlined_call_operand.hbm [shape: f32[1,128], index: 2, kind: output, shape index: {}]  }
   0x1   :  { %8 = vsyncpa [#allocation7], 0 }
   0x2   :  { %9 = vsyncpa [#allocation5], 0  ;;  %s354_s9 = smov [#allocation3]   ;;  %s355_s11 = smov [#allocation6]  }
   0x3   :  { %s16_s10 = sshll.u32 %s354_s9, 4  ;;  %s26_s12 = sshll.u32 %s355_s11, 4  ;;  %s17_s10 = int_to_ptr.vmem [resolvable:$true] %s16_s10  ;;  %s27_s12 = int_to_ptr.vmem [resolvable:$true] %s26_s12 }
   0x4   :  { %s282_s15 = scalar_lea.hbm %s410_s0, 128 }
   0x5   :  { %p283_p0 = scmp.ne.s32.totalorder %s410_s0, %s282_s15  ;;  %p286_p1 = scmp.lt.u32.totalorder %s282_s15, %s410_s0 }
   0x7   :  { %p288_p2 = pnand %p286_p1, %p283_p0 }
   0x9   :  { %291 = shalt.err (!%p288_p2)
}
   0xa   :  { %s292_s20 = scalar_lea.vmem %s17_s10, 128  ;;  %p297_p4 = scmp.lt.s32.totalorder %s17_s10, %s17_s10 }
   0xb   :  { %p293_p3 = scmp.ne.s32.totalorder %s17_s10, %s292_s20  ;;  %p298_p5 = scmp.lt.s32.totalorder %s292_s20, %s292_s20 }
   0xd   :  { %p299_p6 = por %p298_p5, %p297_p4 }
   0xf   :  { %p300_p7 = pnand %p299_p6, %p293_p3 }
  0x11   :  { %303 = shalt.err (!%p300_p7)
}
  0x12   :  { %19 = dma.hbm_to_vmem [thread:$0]  %s410_s0, 128, %s17_s10, [#allocation4]  }
  0x13   :  { %s304_s25 = scalar_lea.hbm %s411_s1, 128 }
  0x14   :  { %p305_p8 = scmp.ne.s32.totalorder %s411_s1, %s304_s25  ;;  %p308_p9 = scmp.lt.u32.totalorder %s304_s25, %s411_s1 }
  0x16   :  { %p310_p10 = pnand %p308_p9, %p305_p8 }
  0x18   :  { %313 = shalt.err (!%p310_p10)
}
  0x19   :  { %s314_s30 = scalar_lea.vmem %s27_s12, 128  ;;  %p319_p12 = scmp.lt.s32.totalorder %s27_s12, %s27_s12 }
  0x1a   :  { %p315_p11 = scmp.ne.s32.totalorder %s27_s12, %s314_s30  ;;  %p320_p13 = scmp.lt.s32.totalorder %s314_s30, %s314_s30 }
  0x1c   :  { %p321_p0 = por %p320_p13, %p319_p12 }
  0x1e   :  { %p322_p1 = pnand %p321_p0, %p315_p11 }
  0x20   :  { %325 = shalt.err (!%p322_p1)
}
  0x21   :  { %29 = dma.hbm_to_vmem [thread:$0]  %s411_s1, 128, %s27_s12, [#allocation7]  }
  0x22   :  { %348 = dma.done.wait [#allocation4], 128  }
  0x23   :  { %349 = vsyncadd [#allocation4], 4294967168 }
  0x24   :  { %350 = dma.done.wait [#allocation7], 128  }
  0x25   :  { %351 = vsyncadd [#allocation7], 4294967168  ;;  %v356_v0 = vmov 0.0   ;;  %vm357_vm0 = vmmov 0   ;;  %v45_v1 = vld [vmem:[#allocation6] sm:$0xff]  ;;  %v44_v3 = vld [vmem:[#allocation3] sm:$0xff]  ;;  %v154_v10 = vlaneseq }
  0x26   :  { %266 = vmatprep.subr.mxu0 %v356_v0  ;;  %268 = vmatprep.mubr.msk.f32.mxu0 %vm357_vm0, %v356_v0  ;;  %v119_v2 = vmul.f32 %v45_v1, %v45_v1  ;;  %v116_v4 = vmul.f32 %v44_v3, %v44_v3  ;;  %v195_v6 = vsub.f32 %v44_v3, %v45_v1  ;;  %vm217_vm4 = vcmask 64512   ;;  %s358_s4 = smov [#allocation8]  }
  0x27   :  { %267 = vmatpush3.xpose.msra.mxu0 %v45_v1  ;;  %v155_v11 = vshrl.u32 %v154_v10, 7  ;;  %v213_v25 = vand.u32 127, %v154_v10  ;;  %s251_s5 = sshll.u32 %s358_s4, 4  ;;  %s252_s5 = int_to_ptr.vmem [resolvable:$true] %s251_s5 }
  0x28   :  { %120 = vadd.xlane.f32.xlu0 %v119_v2  ;;  %v197_v7 = vmul.f32 %v195_v6, %v195_v6  ;;  %s326_s7 = scalar_lea.vmem %s252_s5, 16  ;;  %s330_s8 = scalar_lea.vmem %s252_s5, 32 }
  0x29   :  { %v156_v12 = vsub.s32 0, %v155_v11  ;;  %vm215_vm3 = vcmp.eq.s32.totalorder %v155_v11, %v213_v25  ;;  %vm238_vm5 = vcmp.eq.s32.totalorder %v213_v25, 1  ;;  %vm236_vm6 = vcmp.eq.s32.totalorder %v213_v25, 0  ;;  %p327_p2 = scmp.ne.s32.totalorder %s252_s5, %s326_s7  ;;  %p331_p3 = scmp.lt.s32.totalorder %s252_s5, %s252_s5 }
  0x2a   :  { %269 = vmatmul.mubr.f32.vlgmr.msra.gmra.mrb[0].mxu0 %v44_v3  ;;  %p332_p4 = scmp.lt.s32.totalorder %s330_s8, %s326_s7 }
  0x2c   :  { %117 = vadd.xlane.f32.xlu0 %v116_v4  ;;  %p333_p5 = por %p332_p4, %p331_p3 }
  0x2e   :  { %p334_p6 = pnand %p333_p5, %p327_p2 }
  0xb5   :  { %v121_v5 = vpop.xlane.xlu0 %120 }
  0xb6   :  { %122 = vxpose.xlu1.b32.start.end [1/1] (short) (narrow) %v121_v5, 8 }
  0xb9   :  { %v118_v14 = vpop.xlane.xlu0 %117 }
  0xdd   :  { %198 = vadd.xlane.f32.xlu1 %v197_v7 }
  0xfd   :  { %v112_v8 = vpop.f32.mrb[0].mxu0 }
  0xfe   :  { %v270_v9 = vpop.f32.mrb[1].mxu0  ;;  %v159_v16 = vmul.f32 2.0, %v112_v8 }
 0x136   :  { %v138_v13 = vpop.trf.xlu1 }
 0x137   :  { %v157_v15 = vrot.slane %v138_v13, %v156_v12 }
 0x139   :  { %v158_v17 = vadd.f32 %v157_v15, %v118_v14 }
 0x13b   :  { %v160_v18 = vsub.f32 %v158_v17, %v159_v16 }
 0x13d   :  { %v161_v19 = vmax.f32 %v160_v18, 0.0 }
 0x13f   :  { %280 = vrsqrt.f32 %v161_v19  ;;  %vm164_vm1 = vcmp.eq.f32.partialorder %v161_v19, inf  ;;  %v167_v22 = vand.u32 2147483648, %v161_v19  ;;  %vm166_vm2 = vcmp.eq.f32.partialorder %v161_v19, 0.0 }
 0x149   :  { %v281_v20 = vpop.eup %280 }
 0x14a   :  { %v163_v21 = vmul.f32 %v281_v20, %v161_v19 }
 0x14c   :  { %v165_v23 = vsel %vm164_vm1, %v161_v19, %v163_v21 }
 0x14d   :  { %v168_v24 = vsel %vm166_vm2, %v167_v22, %v165_v23 }
 0x14e   :  { %v169_v26 = vsub.f32 1.0, %v168_v24 }
 0x150   :  { %v170_v27 = vmax.f32 %v169_v26, 0.0 }
 0x152   :  { %v171_v28 = vmul.f32 %v170_v27, %v170_v27 }
 0x154   :  { %v216_v29 = vsel %vm215_vm3, 0.0, %v171_v28 }
 0x155   :  { %v218_v30 = vsel %vm217_vm4, %v216_v29, 0.0 }
 0x156   :  { %219 = vadd.xlane.f32.xlu0 %v218_v30 }
 0x16a   :  { %v199_v31 = vpop.xlane.xlu1 %198 }
 0x16b   :  { %v200_v32 = vrot.slane %v199_v31, 4 }
 0x16d   :  { %v201_v33 = vadd.f32 %v200_v32, %v199_v31 }
 0x16f   :  { %v202_v34 = vrot.slane %v201_v33, 2 }
 0x171   :  { %v203_v35 = vadd.f32 %v202_v34, %v201_v33 }
 0x173   :  { %v204_v36 = vrot.slane %v203_v35, 1 }
 0x175   :  { %v205_v37 = vadd.f32 %v204_v36, %v203_v35 }
 0x177   :  { %271 = vpush %v205_v37 }
 0x1a8   :  { %s272_s1 = spop %271 }
 0x1a9   :  { %v242_v46 = vstv %s272_s1 }
 0x1e3   :  { %v220_v38 = vpop.xlane.xlu0 %219 }
 0x1e4   :  { %v221_v39 = vrot.slane %v220_v38, 4 }
 0x1e6   :  { %v222_v40 = vadd.f32 %v221_v39, %v220_v38 }
 0x1e8   :  { %v223_v41 = vrot.slane %v222_v40, 2 }
 0x1ea   :  { %v224_v42 = vadd.f32 %v223_v41, %v222_v40 }
 0x1ec   :  { %v225_v43 = vrot.slane %v224_v42, 1 }
 0x1ee   :  { %v226_v44 = vadd.f32 %v225_v43, %v224_v42 }
 0x1f0   :  { %273 = vpush %v226_v44 }
 0x221   :  { %s274_s6 = spop %273 }
 0x222   :  { %v240_v45 = vstv %s274_s6 }
 0x223   :  { %v241_v47 = vsel %vm238_vm5, %v240_v45, 0.0 }
 0x224   :  { %v243_v48 = vsel %vm236_vm6, %v242_v46, %v241_v47 }
 0x225   :  { %244 = vst [vmem:[#allocation8] sm:$0x1] %v243_v48 }
 0x226   :  { %337 = shalt.err (!%p334_p6)
}
 0x227   :  { %s338_s11 = scalar_lea.hbm %s412_s2, 16 }
 0x228   :  { %p339_p7 = scmp.ne.s32.totalorder %s412_s2, %s338_s11  ;;  %p342_p8 = scmp.lt.u32.totalorder %s338_s11, %s412_s2 }
 0x22a   :  { %p344_p9 = pnand %p342_p8, %p339_p7 }
 0x22c   :  { %347 = shalt.err (!%p344_p9)
}
 0x22d   :  { %254 = dma.vmem_to_hbm [thread:$0]  %s252_s5, 16, %s412_s2, [#allocation5]  }
 0x22e   :  { %352 = dma.done.wait [#allocation5], 16  }
 0x22f   :  { %353 = vsyncadd [#allocation5], 4294967280 }
 0x230   :  { %258 = vsyncpa [#allocation4], 1 }
 0x231   :  { %259 = vsyncpa [#allocation7], 1 }
 0x232   :  { %260 = vsyncpa [#allocation5], 1 }

</bundles_post_ra>
